<compile_context>
chip_gen: v7x
topology: tpu7x:2x2x1
jax: 0.10.0
libtpu: 0.0.40
codegen_flags: <defaults>
</compile_context>

<pallas_src>
import functools

import jax
import jax.numpy as jnp
from jax.experimental import pallas as pl
from jax.experimental.pallas import tpu as pltpu


def _round_up(x, m):
    return ((x + m - 1) // m) * m


# Per-step x-tile target. ~2 MiB amortizes the ~0.35us per-grid-step cost even at v7x's
# ~1.6 TB/s per-TC HBM bandwidth, while 2 double-buffered x tiles (+ weights) stay well
# under v5e's 16 MiB scoped-VMEM default and far under v7x's 64 MiB physical VMEM.
_TARGET_X_TILE_BYTES = 2 * 1024 * 1024
# Keep one x tile under this so two pipeline buffers fit the v5e scoped default.
_MAX_X_TILE_BYTES = 6 * 1024 * 1024


def _choose_tiles(n, cd, hw, itemsize, row_tile=None, hw_tile=None):
    """Pick (row_tile, hw_tile) from a VMEM/bandwidth budget unless explicitly given."""
    if row_tile is None:
        if n <= 8:
            row_tile = max(n, 1)                      # full dim -> no partial batch block
        else:
            row_tile = min(128, _round_up(n, 8))
            # Prefer >=2 row tiles so the "parallel" axis can span both v7x TensorCores.
            row_tile = min(row_tile, _round_up((n + 1) // 2, 8))
    if hw_tile is None:
        per_hw = max(1, row_tile * cd * itemsize)
        hw_tile = max(128, (_TARGET_X_TILE_BYTES // per_hw) // 128 * 128)
        hw_tile = min(hw_tile, _round_up(hw, 128))
        # VMEM safety for very large C*D feature maps.
        while row_tile > 8 and row_tile * cd * hw_tile * itemsize > _MAX_X_TILE_BYTES:
            row_tile = _round_up(row_tile // 2, 8)
    return int(row_tile), int(hw_tile)


def rotation_head_kernel(x_ref, w1_ref, b1_ref, w2_ref, b2_ref, w3_ref, b3_ref,
                         o_ref, pooled_acc, *, hw, hw_tile):
    """Grid = (row tiles [parallel], H*W tiles [arbitrary, reduction]).

    x_ref      : (row_tile, C*D, hw_tile)  bf16 slab of the encoder feature map
    w*/b*      : lane-dense (zero-padded) head weights; w1 already carries 1/(H*W)
    o_ref      : (row_tile, num_class_padded)   written only on the last hw step
    pooled_acc : VMEM scratch (row_tile, C*D)   running spatial sum (f32)
    """
    k = pl.program_id(1)

    @pl.when(k == 0)
    def _():
        pooled_acc[...] = jnp.zeros_like(pooled_acc)

    # AdaptiveAvgPool3d((None, 1, 1)) == mean over (H, W); the 1/(H*W) scale is folded
    # into w1 (host side, once), so the kernel only accumulates the spatial sum.
    xv = x_ref[...].astype(jnp.float32)               # bf16 stream -> f32 accumulate
    if hw % hw_tile != 0:
        # Ragged last H*W tile: mask lanes past the true extent (replaces host-side pad).
        pos = k * hw_tile + jax.lax.broadcasted_iota(jnp.int32, xv.shape, 2)
        xv = jnp.where(pos < hw, xv, 0.0)
    pooled_acc[...] += jnp.sum(xv, axis=-1)           # (row_tile, C*D)

    @pl.when(k == pl.num_programs(1) - 1)
    def _():
        # FullyConnected: Linear -> ReLU -> Linear -> ReLU, then the final classifier.
        h = jnp.dot(pooled_acc[...], w1_ref[...], preferred_element_type=jnp.float32)
        h = jnp.maximum(h + b1_ref[...], 0.0)
        h = jnp.dot(h, w2_ref[...], preferred_element_type=jnp.float32)
        h = jnp.maximum(h + b2_ref[...], 0.0)
        o_ref[...] = jnp.dot(h, w3_ref[...],
                             preferred_element_type=jnp.float32) + b3_ref[...]


def init_rotation_params(key, input_size, hidden_size, num_class):
    """Deterministic synthetic parameters (PyTorch Linear convention W:(out,in);
    pre-transposed to (in,out) so the head computes x @ W + b)."""
    ks = jax.random.split(key, 6)
    s1 = 1.0 / jnp.sqrt(input_size)
    s2 = 1.0 / jnp.sqrt(hidden_size)
    s3 = 1.0 / jnp.sqrt(hidden_size // 2)
    w1 = jax.random.uniform(ks[0], (input_size, hidden_size), jnp.float32, -s1, s1)
    b1 = jax.random.uniform(ks[1], (1, hidden_size), jnp.float32, -s1, s1)
    w2 = jax.random.uniform(ks[2], (hidden_size, hidden_size // 2), jnp.float32, -s2, s2)
    b2 = jax.random.uniform(ks[3], (1, hidden_size // 2), jnp.float32, -s2, s2)
    w3 = jax.random.uniform(ks[4], (hidden_size // 2, num_class), jnp.float32, -s3, s3)
    b3 = jax.random.uniform(ks[5], (1, num_class), jnp.float32, -s3, s3)
    return w1, b1, w2, b2, w3, b3


def prepare_rotation_head(weights, hw):
    """One-time host prep (hoisted out of the per-call path): fold the 1/(H*W) mean-pool
    scale into w1 and zero-pad every feature dim to a lane-dense multiple of 128.
    Zero padding is exact: ReLU(0)=0 and zero rows/cols contribute nothing."""
    w1, b1, w2, b2, w3, b3 = weights
    input_size, hidden = w1.shape
    half = w2.shape[1]
    num_class = w3.shape[1]
    Hp1, Hp2, Cp = _round_up(hidden, 128), _round_up(half, 128), _round_up(num_class, 128)
    f32 = jnp.float32
    w1p = jnp.zeros((input_size, Hp1), f32).at[:, :hidden].set(w1 * (1.0 / float(hw)))
    b1p = jnp.zeros((1, Hp1), f32).at[:, :hidden].set(b1)
    w2p = jnp.zeros((Hp1, Hp2), f32).at[:hidden, :half].set(w2)
    b2p = jnp.zeros((1, Hp2), f32).at[:, :half].set(b2)
    w3p = jnp.zeros((Hp2, Cp), f32).at[:half, :num_class].set(w3)
    b3p = jnp.zeros((1, Cp), f32).at[:, :num_class].set(b3)
    return w1p, b1p, w2p, b2p, w3p, b3p


@functools.partial(jax.jit,
                   static_argnames=("num_class", "hw_tile", "row_tile", "stream_dtype"))
def rotation_model_forward(feat_ncdhw, prepared, num_class, *,
                           hw_tile=None, row_tile=None, stream_dtype=jnp.bfloat16):
    """feat_ncdhw: encoder output (N, C, D, H, W). prepared = prepare_rotation_head(...)."""
    N, C, D, H, W = feat_ncdhw.shape
    CD, HW = C * D, H * W
    w1p, b1p, w2p, b2p, w3p, b3p = prepared
    Cp = w3p.shape[1]

    itemsize = jnp.dtype(stream_dtype).itemsize
    row_tile, hw_tile = _choose_tiles(N, CD, HW, itemsize, row_tile, hw_tile)

    # No host-side pad of x (a pad would cost a full extra HBM read+write of the dominant
    # tensor): ragged batch / H*W edges are handled by partial blocks + in-kernel masking.
    # Streaming bf16 halves the dominant HBM traffic; accumulation stays f32 in-kernel.
    # TODO(synk): ideally the encoder emits bf16 directly so this cast fuses/disappears.
    x = feat_ncdhw.reshape(N, CD, HW).astype(stream_dtype)

    grid = (pl.cdiv(N, row_tile), pl.cdiv(HW, hw_tile))

    # Generation-aware VMEM budget: only raise the scoped-VMEM limit when the estimate
    # exceeds the most conservative default (v5e: 16 MiB); cap below v7x's 64 MiB physical.
    weight_bytes = sum(int(a.size) * a.dtype.itemsize
                       for a in (w1p, b1p, w2p, b2p, w3p, b3p))
    x_tile_bytes = row_tile * CD * hw_tile * itemsize
    vmem_est = (2 * x_tile_bytes + 2 * weight_bytes
                + 2 * row_tile * Cp * 4 + row_tile * CD * 4)
    cparams = dict(dimension_semantics=("parallel", "arbitrary"))
    if vmem_est > 12 * 1024 * 1024:
        cparams["vmem_limit_bytes"] = int(min(max(2 * vmem_est, 32 << 20), 48 << 20))

    # TODO(synk): the constant weight blocks could be single-buffered
    #             (pipeline_mode=pl.Buffered(1)) to free VMEM at large hidden sizes.
    out = pl.pallas_call(
        functools.partial(rotation_head_kernel, hw=HW, hw_tile=hw_tile),
        out_shape=jax.ShapeDtypeStruct((N, Cp), jnp.float32),
        grid_spec=pltpu.PrefetchScalarGridSpec(
            num_scalar_prefetch=0,
            grid=grid,
            in_specs=[
                pl.BlockSpec((row_tile, CD, hw_tile), lambda i, k: (i, 0, k)),  # x tiles
                pl.BlockSpec(w1p.shape, lambda i, k: (0, 0)),   # w1 (pre-scaled by 1/HW)
                pl.BlockSpec(b1p.shape, lambda i, k: (0, 0)),   # b1
                pl.BlockSpec(w2p.shape, lambda i, k: (0, 0)),   # w2
                pl.BlockSpec(b2p.shape, lambda i, k: (0, 0)),   # b2
                pl.BlockSpec(w3p.shape, lambda i, k: (0, 0)),   # w3
                pl.BlockSpec(b3p.shape, lambda i, k: (0, 0)),   # b3
            ],
            out_specs=pl.BlockSpec((row_tile, Cp), lambda i, k: (i, 0)),
            scratch_shapes=[pltpu.VMEM((row_tile, CD), jnp.float32)],
        ),
        compiler_params=pltpu.CompilerParams(**cparams),
    )(x, w1p, b1p, w2p, b2p, w3p, b3p)

    return out[:, :num_class]


def reference_forward(feat_ncdhw, weights, num_class):
    """Pure-JAX f32 reference mirroring the PyTorch forward semantics."""
    N = feat_ncdhw.shape[0]
    w1, b1, w2, b2, w3, b3 = weights
    pooled = feat_ncdhw.mean(axis=(3, 4)).reshape(N, -1)  # AdaptiveAvgPool3d + view
    h = jnp.maximum(pooled @ w1 + b1, 0.0)
    h = jnp.maximum(h @ w2 + b2, 0.0)
    return h @ w3 + b3


if __name__ == "__main__":
    # Small config consistent with the module: batch=4 (batch_size_val),
    # encoder feature-map channels=4, depth=8, spatial 16x16.
    N, C, D, H, W = 4, 4, 8, 16, 16
    input_size = C * D        # params['SSL']['input_size'] == flattened pooled features
    hidden_size = 32          # params['SSL']['hidden_size']
    num_class = 4             # params['SSL']['num_class']  (4 rotation classes)

    key = jax.random.PRNGKey(0)
    kx, kw = jax.random.split(key)
    feat = jax.random.normal(kx, (N, C, D, H, W), dtype=jnp.float32)
    weights = init_rotation_params(kw, input_size, hidden_size, num_class)
    prepared = prepare_rotation_head(weights, H * W)

    out = jax.block_until_ready(rotation_model_forward(feat, prepared, num_class))
    ref = reference_forward(feat, weights, num_class)
    assert out.shape == (N, num_class)
    # bf16 input stream -> loose tolerance vs the pure-f32 reference.
    assert jnp.allclose(out, ref, atol=1e-2, rtol=1e-2), "mismatch vs reference (config 1)"

    # Second config: ragged H*W (not a multiple of hw_tile) and multiple reduction steps,
    # exercising the in-kernel mask that replaced the host-side pad.
    H2 = W2 = 20
    feat2 = jax.random.normal(jax.random.PRNGKey(1), (N, C, D, H2, W2), dtype=jnp.float32)
    prepared2 = prepare_rotation_head(weights, H2 * W2)
    out2 = jax.block_until_ready(
        rotation_model_forward(feat2, prepared2, num_class, hw_tile=128))
    ref2 = reference_forward(feat2, weights, num_class)
    assert out2.shape == (N, num_class)
    assert jnp.allclose(out2, ref2, atol=1e-2, rtol=1e-2), "mismatch vs reference (config 2)"

    print("KERNEL_OK")
</pallas_src>

<mosaic_0001>
module attributes {stable_mosaic.version = 11 : i64} {
  func.func @rotation_head_kernel(%arg0: i32, %arg1: i32, %arg2: memref<4x32x256xbf16, #tpu.memory_space<vmem>>, %arg3: memref<32x128xf32, #tpu.memory_space<vmem>>, %arg4: memref<1x128xf32, #tpu.memory_space<vmem>>, %arg5: memref<128x128xf32, #tpu.memory_space<vmem>>, %arg6: memref<1x128xf32, #tpu.memory_space<vmem>>, %arg7: memref<128x128xf32, #tpu.memory_space<vmem>>, %arg8: memref<1x128xf32, #tpu.memory_space<vmem>>, %arg9: memref<4x128xf32, #tpu.memory_space<vmem>>, %arg10: memref<4x32xf32, #tpu.memory_space<vmem>>) attributes {dimension_semantics = [#tpu.dimension_semantics<parallel>, #tpu.dimension_semantics<arbitrary>], iteration_bounds = array<i64: 1, 1>, scalar_prefetch = 0 : i64, scratch_operands = 1 : i64, tpu.core_type = #tpu.core_type<tc>, window_params = [{transform_indices = @transform_0, window_bounds = array<i64: 4, 32, 256>}, {pipeline_mode = #tpu.pipeline_mode<synchronous>, transform_indices = @transform_1, window_bounds = array<i64: 32, 128>}, {pipeline_mode = #tpu.pipeline_mode<synchronous>, transform_indices = @transform_2, window_bounds = array<i64: 1, 128>}, {pipeline_mode = #tpu.pipeline_mode<synchronous>, transform_indices = @transform_3, window_bounds = array<i64: 128, 128>}, {pipeline_mode = #tpu.pipeline_mode<synchronous>, transform_indices = @transform_4, window_bounds = array<i64: 1, 128>}, {pipeline_mode = #tpu.pipeline_mode<synchronous>, transform_indices = @transform_5, window_bounds = array<i64: 128, 128>}, {pipeline_mode = #tpu.pipeline_mode<synchronous>, transform_indices = @transform_6, window_bounds = array<i64: 1, 128>}, {transform_indices = @transform_7, window_bounds = array<i64: 4, 128>}]} {
    %c0_i32 = arith.constant 0 : i32
    %0 = arith.cmpi eq, %arg1, %c0_i32 : i32
    %1 = arith.extui %0 : i1 to i32
    %c0_i32_0 = arith.constant 0 : i32
    %2 = arith.cmpi ne, %1, %c0_i32_0 : i32
    scf.if %2 {
      %cst_9 = arith.constant 0.000000e+00 : f32
      %12 = vector.broadcast %cst_9 : f32 to vector<4x32xf32>
      %c0_10 = arith.constant 0 : index
      %c0_11 = arith.constant 0 : index
      %13 = vector.load %arg10[%c0_10, %c0_11] : memref<4x32xf32, #tpu.memory_space<vmem>>, vector<4x32xf32>
      tpu.vector_store %arg10[%c0_10, %c0_11], %12 {strides = array<i32>} : memref<4x32xf32, #tpu.memory_space<vmem>>, vector<4x32xf32>,
    } else {
    }
    %c0 = arith.constant 0 : index
    %c0_1 = arith.constant 0 : index
    %c0_2 = arith.constant 0 : index
    %3 = vector.load %arg2[%c0, %c0_1, %c0_2] : memref<4x32x256xbf16, #tpu.memory_space<vmem>>, vector<4x32x256xbf16>
    %4 = arith.extf %3 : vector<4x32x256xbf16> to vector<4x32x256xf32>
    %c0_3 = arith.constant 0 : index
    %c0_4 = arith.constant 0 : index
    %5 = vector.load %arg10[%c0_3, %c0_4] : memref<4x32xf32, #tpu.memory_space<vmem>>, vector<4x32xf32>
    %cst = arith.constant dense<0.000000e+00> : vector<4x32xf32>
    %6 = vector.multi_reduction <add>, %4, %cst [2] : vector<4x32x256xf32> to vector<4x32xf32>
    %7 = arith.addf %5, %6 : vector<4x32xf32>
    %c0_5 = arith.constant 0 : index
    %c0_6 = arith.constant 0 : index
    %8 = vector.load %arg10[%c0_5, %c0_6] : memref<4x32xf32, #tpu.memory_space<vmem>>, vector<4x32xf32>
    tpu.vector_store %arg10[%c0_5, %c0_6], %7 {strides = array<i32>} : memref<4x32xf32, #tpu.memory_space<vmem>>, vector<4x32xf32>,
    %c0_i32_7 = arith.constant 0 : i32
    %9 = arith.cmpi eq, %arg1, %c0_i32_7 : i32
    %10 = arith.extui %9 : i1 to i32
    %c0_i32_8 = arith.constant 0 : i32
    %11 = arith.cmpi ne, %10, %c0_i32_8 : i32
    scf.if %11 {
      %c0_9 = arith.constant 0 : index
      %c0_10 = arith.constant 0 : index
      %12 = vector.load %arg10[%c0_9, %c0_10] : memref<4x32xf32, #tpu.memory_space<vmem>>, vector<4x32xf32>
      %c0_11 = arith.constant 0 : index
      %c0_12 = arith.constant 0 : index
      %13 = vector.load %arg3[%c0_11, %c0_12] : memref<32x128xf32, #tpu.memory_space<vmem>>, vector<32x128xf32>
      %cst_13 = arith.constant dense<0.000000e+00> : vector<4x128xf32>
      %14 = tpu.matmul %12, %13, %cst_13 {dimension_numbers = #tpu.dot_dimension_numbers<[1], [0], [0], [1], [0, 0, 1, 1], [], []>} : vector<4x32xf32>, vector<32x128xf32>, vector<4x128xf32> -> vector<4x128xf32>
      %c0_14 = arith.constant 0 : index
      %c0_15 = arith.constant 0 : index
      %15 = vector.load %arg4[%c0_14, %c0_15] : memref<1x128xf32, #tpu.memory_space<vmem>>, vector<1x128xf32>
      %16 = vector.broadcast %15 : vector<1x128xf32> to vector<4x128xf32>
      %17 = arith.addf %14, %16 : vector<4x128xf32>
      %cst_16 = arith.constant 0.000000e+00 : f32
      %18 = vector.broadcast %cst_16 : f32 to vector<4x128xf32>
      %19 = arith.maximumf %17, %18 : vector<4x128xf32>
      %c0_17 = arith.constant 0 : index
      %c0_18 = arith.constant 0 : index
      %20 = vector.load %arg5[%c0_17, %c0_18] : memref<128x128xf32, #tpu.memory_space<vmem>>, vector<128x128xf32>
      %cst_19 = arith.constant dense<0.000000e+00> : vector<4x128xf32>
      %21 = tpu.matmul %19, %20, %cst_19 {dimension_numbers = #tpu.dot_dimension_numbers<[1], [0], [0], [1], [0, 0, 1, 1], [], []>} : vector<4x128xf32>, vector<128x128xf32>, vector<4x128xf32> -> vector<4x128xf32>
      %c0_20 = arith.constant 0 : index
      %c0_21 = arith.constant 0 : index
      %22 = vector.load %arg6[%c0_20, %c0_21] : memref<1x128xf32, #tpu.memory_space<vmem>>, vector<1x128xf32>
      %23 = vector.broadcast %22 : vector<1x128xf32> to vector<4x128xf32>
      %24 = arith.addf %21, %23 : vector<4x128xf32>
      %cst_22 = arith.constant 0.000000e+00 : f32
      %25 = vector.broadcast %cst_22 : f32 to vector<4x128xf32>
      %26 = arith.maximumf %24, %25 : vector<4x128xf32>
      %c0_23 = arith.constant 0 : index
      %c0_24 = arith.constant 0 : index
      %27 = vector.load %arg7[%c0_23, %c0_24] : memref<128x128xf32, #tpu.memory_space<vmem>>, vector<128x128xf32>
      %cst_25 = arith.constant dense<0.000000e+00> : vector<4x128xf32>
      %28 = tpu.matmul %26, %27, %cst_25 {dimension_numbers = #tpu.dot_dimension_numbers<[1], [0], [0], [1], [0, 0, 1, 1], [], []>} : vector<4x128xf32>, vector<128x128xf32>, vector<4x128xf32> -> vector<4x128xf32>
      %c0_26 = arith.constant 0 : index
      %c0_27 = arith.constant 0 : index
      %29 = vector.load %arg8[%c0_26, %c0_27] : memref<1x128xf32, #tpu.memory_space<vmem>>, vector<1x128xf32>
      %30 = vector.broadcast %29 : vector<1x128xf32> to vector<4x128xf32>
      %31 = arith.addf %28, %30 : vector<4x128xf32>
      %c0_28 = arith.constant 0 : index
      %c0_29 = arith.constant 0 : index
      %32 = vector.load %arg9[%c0_28, %c0_29] : memref<4x128xf32, #tpu.memory_space<vmem>>, vector<4x128xf32>
      tpu.vector_store %arg9[%c0_28, %c0_29], %31 {strides = array<i32>} : memref<4x128xf32, #tpu.memory_space<vmem>>, vector<4x128xf32>,
    } else {
    }
    return
  }
  func.func @transform_0(%arg0: i32, %arg1: i32) -> (i32, i32, i32) {
    %c0_i32 = arith.constant 0 : i32
    %c0_i32_0 = arith.constant 0 : i32
    return %arg0, %c0_i32, %arg1 : i32, i32, i32
  }
  func.func @transform_1(%arg0: i32, %arg1: i32) -> (i32, i32) {
    %c0_i32 = arith.constant 0 : i32
    %c0_i32_0 = arith.constant 0 : i32
    %c0_i32_1 = arith.constant 0 : i32
    return %c0_i32, %c0_i32_0 : i32, i32
  }
  func.func @transform_2(%arg0: i32, %arg1: i32) -> (i32, i32) {
    %c0_i32 = arith.constant 0 : i32
    %c0_i32_0 = arith.constant 0 : i32
    %c0_i32_1 = arith.constant 0 : i32
    return %c0_i32, %c0_i32_0 : i32, i32
  }
  func.func @transform_3(%arg0: i32, %arg1: i32) -> (i32, i32) {
    %c0_i32 = arith.constant 0 : i32
    %c0_i32_0 = arith.constant 0 : i32
    %c0_i32_1 = arith.constant 0 : i32
    return %c0_i32, %c0_i32_0 : i32, i32
  }
  func.func @transform_4(%arg0: i32, %arg1: i32) -> (i32, i32) {
    %c0_i32 = arith.constant 0 : i32
    %c0_i32_0 = arith.constant 0 : i32
    %c0_i32_1 = arith.constant 0 : i32
    return %c0_i32, %c0_i32_0 : i32, i32
  }
  func.func @transform_5(%arg0: i32, %arg1: i32) -> (i32, i32) {
    %c0_i32 = arith.constant 0 : i32
    %c0_i32_0 = arith.constant 0 : i32
    %c0_i32_1 = arith.constant 0 : i32
    return %c0_i32, %c0_i32_0 : i32, i32
  }
  func.func @transform_6(%arg0: i32, %arg1: i32) -> (i32, i32) {
    %c0_i32 = arith.constant 0 : i32
    %c0_i32_0 = arith.constant 0 : i32
    %c0_i32_1 = arith.constant 0 : i32
    return %c0_i32, %c0_i32_0 : i32, i32
  }
  func.func @transform_7(%arg0: i32, %arg1: i32) -> (i32, i32) {
    %c0_i32 = arith.constant 0 : i32
    %c0_i32_0 = arith.constant 0 : i32
    return %arg0, %c0_i32 : i32, i32
  }
}

</mosaic_0001>

<bundles_post_ra>
// kernel: rotation_model_forward.1
= control target key start
LH: loop header
LB: loop body
LE: loop exit
PB: predicated region body
PF: predicated region fallthrough
CT: control target
= control target key end

     0   :  { %s998_s0 = inlined_call_operand.vmem [shape: bf16[4,32,256], index: 0, kind: input, shape index: {}]   ;;  %s999_s1 = inlined_call_operand.vmem [shape: f32[32,128], index: 1, kind: input, shape index: {}]   ;;  %s1000_s2 = inlined_call_operand.vmem [shape: f32[1,128], index: 2, kind: input, shape index: {}]   ;;  %s1001_s3 = inlined_call_operand.vmem [shape: f32[128,128], index: 3, kind: input, shape index: {}]   ;;  %s1002_s4 = inlined_call_operand.vmem [shape: f32[1,128], index: 4, kind: input, shape index: {}]   ;;  %s1003_s5 = inlined_call_operand.vmem [shape: f32[128,128], index: 5, kind: input, shape index: {}]   ;;  %s1004_s6 = inlined_call_operand.vmem [shape: f32[1,128], index: 6, kind: input, shape index: {}]   ;;  %s1005_s7 = inlined_call_operand.hbm [shape: f32[4,128], index: 7, kind: output, shape index: {}]  }
   0x1   :  { %v37_v0 = vld [vmem:[%s998_s0 + $0x20] sm:$0xff]  ;;  %v38_v2 = vld [vmem:[%s998_s0 + $0x28] sm:$0xff]  ;;  %v39_v8 = vld [vmem:[%s998_s0 + $0x30] sm:$0xff] }
   0x2   :  { %v33_v1 = vld [vmem:[%s998_s0] sm:$0xff]  ;;  %v57_v3 = vunpack.c.l.bf16 %v37_v0  ;;  %v58_v4 = vunpack.c.h.bf16 %v37_v0  ;;  %v34_v7 = vld [vmem:[%s998_s0 + $0x8] sm:$0xff]  ;;  %v59_v9 = vunpack.c.l.bf16 %v38_v2  ;;  %v60_v10 = vunpack.c.h.bf16 %v38_v2  ;;  %v35_v13 = vld [vmem:[%s998_s0 + $0x10] sm:$0xff] }
   0x3   :  { %v49_v5 = vunpack.c.l.bf16 %v33_v1  ;;  %v50_v6 = vunpack.c.h.bf16 %v33_v1  ;;  %v51_v11 = vunpack.c.l.bf16 %v34_v7  ;;  %v52_v12 = vunpack.c.h.bf16 %v34_v7  ;;  %v42_v22 = vld [vmem:[%s998_s0 + $0x48] sm:$0xff] }
   0x4   :  { %v94_v14 = vadd.f32 %v58_v4, %v57_v3  ;;  %v61_v16 = vunpack.c.l.bf16 %v39_v8  ;;  %v62_v17 = vunpack.c.h.bf16 %v39_v8  ;;  %v97_v18 = vadd.f32 %v60_v10, %v59_v9 }
   0x5   :  { %v82_v15 = vadd.f32 %v50_v6, %v49_v5  ;;  %v85_v19 = vadd.f32 %v52_v12, %v51_v11  ;;  %v53_v20 = vunpack.c.l.bf16 %v35_v13  ;;  %v54_v21 = vunpack.c.h.bf16 %v35_v13 }
   0x6   :  { %95 = vadd.xlane.f32.xlu1 %v94_v14 }
   0x7   :  { %83 = vadd.xlane.f32.xlu0 %v82_v15 }
   0x8   :  { %12 = vsyncpa [#allocation4], 0  ;;  %v41_v23 = vld [vmem:[%s998_s0 + $0x40] sm:$0xff]  ;;  %v100_v24 = vadd.f32 %v62_v17, %v61_v16  ;;  %v67_v25 = vunpack.c.l.bf16 %v42_v22  ;;  %v88_v26 = vadd.f32 %v54_v21, %v53_v20  ;;  %v68_v27 = vunpack.c.h.bf16 %v42_v22  ;;  %v40_v30 = vld [vmem:[%s998_s0 + $0x38] sm:$0xff] }
   0x9   :  { %v65_v28 = vunpack.c.l.bf16 %v41_v23  ;;  %v66_v29 = vunpack.c.h.bf16 %v41_v23  ;;  %v36_v31 = vld [vmem:[%s998_s0 + $0x18] sm:$0xff]  ;;  %v63_v32 = vunpack.c.l.bf16 %v40_v30  ;;  %v64_v33 = vunpack.c.h.bf16 %v40_v30  ;;  %v45_v38 = vld [vmem:[%s998_s0 + $0x60] sm:$0xff]  ;;  %v43_v39 = vld [vmem:[%s998_s0 + $0x50] sm:$0xff] }
   0xa   :  { %98 = vadd.xlane.f32.xlu1 %v97_v18  ;;  %v109_v34 = vadd.f32 %v68_v27, %v67_v25  ;;  %v55_v36 = vunpack.c.l.bf16 %v36_v31  ;;  %v56_v37 = vunpack.c.h.bf16 %v36_v31  ;;  %v73_v41 = vunpack.c.l.bf16 %v45_v38  ;;  %v44_v46 = vld [vmem:[%s998_s0 + $0x58] sm:$0xff]  ;;  %v46_v47 = vld [vmem:[%s998_s0 + $0x68] sm:$0xff]  ;;  %v47_v54 = vld [vmem:[%s998_s0 + $0x70] sm:$0xff] }
   0xb   :  { %86 = vadd.xlane.f32.xlu0 %v85_v19  ;;  %v106_v35 = vadd.f32 %v66_v29, %v65_v28  ;;  %v103_v40 = vadd.f32 %v64_v33, %v63_v32  ;;  %v74_v43 = vunpack.c.h.bf16 %v45_v38  ;;  %v69_v44 = vunpack.c.l.bf16 %v43_v39  ;;  %v48_v55 = vld [vmem:[%s998_s0 + $0x78] sm:$0xff]  ;;  %v244_v1 = vld [vmem:[%s999_s1] sm:$0xff]  ;;  %v245_v2 = vld [vmem:[%s999_s1 + $0x8] sm:$0xff]  ;;  %s741_s0 = smov [#allocation3]  }
   0xc   :  { %v91_v42 = vadd.f32 %v56_v37, %v55_v36  ;;  %v70_v45 = vunpack.c.h.bf16 %v43_v39  ;;  %v71_v48 = vunpack.c.l.bf16 %v44_v46  ;;  %v72_v49 = vunpack.c.h.bf16 %v44_v46  ;;  %v246_v3 = vld [vmem:[%s999_s1 + $0x10] sm:$0xff]  ;;  %v247_v6 = vld [vmem:[%s999_s1 + $0x18] sm:$0xff]  ;;  %v330_v8 = vld [vmem:[%s1001_s3] sm:$0xff]  ;;  %s524_s10 = sshll.u32 %s741_s0, 4  ;;  %s525_s10 = int_to_ptr.vmem [resolvable:$true] %s524_s10 }
   0xd   :  { %v118_v50 = vadd.f32 %v74_v43, %v73_v41  ;;  %v75_v52 = vunpack.c.l.bf16 %v46_v47  ;;  %v76_v53 = vunpack.c.h.bf16 %v46_v47  ;;  %v77_v57 = vunpack.c.l.bf16 %v47_v54  ;;  %v331_v9 = vld [vmem:[%s1001_s3 + $0x8] sm:$0xff]  ;;  %v332_v10 = vld [vmem:[%s1001_s3 + $0x10] sm:$0xff]  ;;  %v333_v12 = vld [vmem:[%s1001_s3 + $0x18] sm:$0xff]  ;;  %p719_p1 = scmp.lt.s32.totalorder %s525_s10, %s525_s10 }
   0xe   :  { %101 = vadd.xlane.f32.xlu1 %v100_v24  ;;  %v112_v51 = vadd.f32 %v70_v45, %v69_v44  ;;  %v115_v56 = vadd.f32 %v72_v49, %v71_v48  ;;  %v78_v59 = vunpack.c.h.bf16 %v47_v54  ;;  %v79_v60 = vunpack.c.l.bf16 %v48_v55  ;;  %v334_v14 = vld [vmem:[%s1001_s3 + $0x20] sm:$0xff]  ;;  %v335_v15 = vld [vmem:[%s1001_s3 + $0x28] sm:$0xff]  ;;  %v336_v17 = vld [vmem:[%s1001_s3 + $0x30] sm:$0xff] }
   0xf   :  { %89 = vadd.xlane.f32.xlu0 %v88_v26  ;;  %v121_v58 = vadd.f32 %v76_v53, %v75_v52  ;;  %v80_v61 = vunpack.c.h.bf16 %v48_v55  ;;  %vm31_vm0 = vcmask 257024   ;;  %v738_v0 = vmov 0.0   ;;  %v337_v18 = vld [vmem:[%s1001_s3 + $0x38] sm:$0xff]  ;;  %v338_v20 = vld [vmem:[%s1001_s3 + $0x40] sm:$0xff]  ;;  %v339_v21 = vld [vmem:[%s1001_s3 + $0x48] sm:$0xff] }
  0x10   :  { %v124_v62 = vadd.f32 %v78_v59, %v77_v57  ;;  %32 = vst.msk [vmem:[#allocation2] sm:$0xf] %vm31_vm0, %v738_v0  ;;  %v739_v4 = vmov 0.0|0.0   ;;  %v657_v5 = vpack.c.bf16 %v245_v2, %v244_v1  ;;  %v660_v7 = vpack.c.bf16 %v247_v6, %v246_v3  ;;  %v340_v23 = vld [vmem:[%s1001_s3 + $0x50] sm:$0xff]  ;;  %v341_v24 = vld [vmem:[%s1001_s3 + $0x58] sm:$0xff]  ;;  %v342_v26 = vld [vmem:[%s1001_s3 + $0x60] sm:$0xff] }
  0x11   :  { %v127_v63 = vadd.f32 %v80_v61, %v79_v60  ;;  %656 = vmatprep.subr.bf16.mxu0 %v739_v4  ;;  %662 = vmatprep.subr.bf16.mxu1 %v739_v4  ;;  %vm740_vm1 = vmmov 0   ;;  %v663_v11 = vpack.c.bf16 %v331_v9, %v330_v8  ;;  %v666_v13 = vpack.c.bf16 %v333_v12, %v332_v10  ;;  %v343_v27 = vld [vmem:[%s1001_s3 + $0x68] sm:$0xff] }
  0x12   :  { %110 = vadd.xlane.f32.xlu1 %v109_v34  ;;  %658 = vmatpush3.bf16.msra.mxu0 %v657_v5  ;;  %v669_v16 = vpack.c.bf16 %v335_v15, %v334_v14  ;;  %v672_v19 = vpack.c.bf16 %v337_v18, %v336_v17  ;;  %v675_v22 = vpack.c.bf16 %v339_v21, %v338_v20  ;;  %v146_v33 = vlaneseq }
  0x13   :  { %107 = vadd.xlane.f32.xlu0 %v106_v35  ;;  %659 = vmatprep.subr.bf16.mxu0 %v739_v4  ;;  %v678_v25 = vpack.c.bf16 %v341_v24, %v340_v23  ;;  %v681_v28 = vpack.c.bf16 %v343_v27, %v342_v26  ;;  %vm157_vm2 = vcmask 130112   ;;  %vm164_vm3 = vcmask 195712   ;;  %v344_v27 = vld [vmem:[%s1001_s3 + $0x70] sm:$0xff] }
  0x14   :  { %583 = vmatprep.mubr.msk.f32.mxu0 %vm740_vm1, %v738_v0  ;;  %618 = vmatprep.mubr.msk.f32.mxu1 %vm740_vm1, %v738_v0  ;;  %v147_v36 = vand.u32 127, %v146_v33  ;;  %v149_v39 = vshrl.u32 %v146_v33, 7  ;;  %vm171_vm4 = vcmask 261312   ;;  %vm230_vm5 = vcmask 1041409   ;;  %v427_v33 = vld [vmem:[%s1003_s5 + $0x18] sm:$0xff] }
  0x15   :  { %664 = vmatpush3.bf16.msra.mxu1 %v663_v11  ;;  %vm232_vm6 = vcmask 1042434   ;;  %vm234_vm7 = vcmask 1043459   ;;  %vm255_vm8 = vcmask 261120  }
  0x16   :  { %104 = vadd.xlane.f32.xlu1 %v103_v40  ;;  %661 = vmatpush3.bf16.msra.mxu0 %v660_v7  ;;  %v152_v40 = vadd.s32 4294967288, %v147_v36  ;;  %v159_v41 = vadd.s32 4294967280, %v147_v36  ;;  %v150_v45 = vsub.s32 %v147_v36, %v149_v39 }
  0x17   :  { %92 = vadd.xlane.f32.xlu0 %v91_v42  ;;  %686 = vmatprep.subr.bf16.mxu0 %v739_v4  ;;  %v166_v42 = vadd.s32 4294967272, %v147_v36  ;;  %v81_v21 = vld [vmem:[#allocation2] sm:$0xf]  ;;  %v429_v36 = vld [vmem:[%s1003_s5 + $0x28] sm:$0xff] }
  0x18   :  { %665 = vmatprep.subr.bf16.mxu1 %v739_v4  ;;  %v155_v46 = vsub.s32 %v152_v40, %v149_v39  ;;  %v162_v47 = vsub.s32 %v159_v41, %v149_v39  ;;  %v432_v41 = vld [vmem:[%s1003_s5 + $0x40] sm:$0xff] }
  0x19   :  { %667 = vmatpush3.bf16.msra.mxu1 %v666_v13  ;;  %v169_v48 = vsub.s32 %v166_v42, %v149_v39  ;;  %v431_v39 = vld [vmem:[%s1003_s5 + $0x38] sm:$0xff]  ;;  %v433_v42 = vld [vmem:[%s1003_s5 + $0x48] sm:$0xff] }
  0x1a   :  { %119 = vadd.xlane.f32.xlu1 %v118_v50  ;;  %668 = vmatprep.subr.bf16.mxu1 %v739_v4 }
  0x1b   :  { %113 = vadd.xlane.f32.xlu0 %v112_v51 }
  0x1d   :  { %670 = vmatpush3.bf16.msra.mxu1 %v669_v16 }
  0x1e   :  { %116 = vadd.xlane.f32.xlu1 %v115_v56  ;;  %671 = vmatprep.subr.bf16.mxu1 %v739_v4 }
  0x1f   :  { %122 = vadd.xlane.f32.xlu0 %v121_v58 }
  0x21   :  { %673 = vmatpush3.bf16.msra.mxu1 %v672_v19 }
  0x22   :  { %128 = vadd.xlane.f32.xlu1 %v127_v63  ;;  %674 = vmatprep.subr.bf16.mxu1 %v739_v4 }
  0x23   :  { %125 = vadd.xlane.f32.xlu0 %v124_v62 }
  0x25   :  { %676 = vmatpush3.bf16.msra.mxu1 %v675_v22 }
  0x26   :  { %677 = vmatprep.subr.bf16.mxu1 %v739_v4 }
  0x29   :  { %679 = vmatpush3.bf16.msra.mxu1 %v678_v25 }
  0x2a   :  { %680 = vmatprep.subr.bf16.mxu1 %v739_v4 }
  0x2d   :  { %682 = vmatpush3.bf16.msra.mxu1 %v681_v28  ;;  %v345_v28 = vld [vmem:[%s1001_s3 + $0x78] sm:$0xff] }
  0x2e   :  { %683 = vmatprep.subr.bf16.mxu1 %v739_v4 }
  0x93   :  { %v96_v29 = vpop.xlane.xlu1 %95 }
  0x94   :  { %v84_v30 = vpop.xlane.xlu0 %83  ;;  %v176_v51 = vrot.slane %v96_v29, %v150_v45  ;;  %v684_v29 = vpack.c.bf16 %v345_v28, %v344_v27 }
  0x95   :  { %v151_v58 = vrot.slane %v84_v30, %v150_v45  ;;  %v424_v30 = vld [vmem:[%s1003_s5] sm:$0xff] }
  0x96   :  { %685 = vmatpush3.bf16.msra.mxu1 %v684_v29 }
  0x97   :  { %v99_v31 = vpop.xlane.xlu1 %98 }
  0x98   :  { %v87_v32 = vpop.xlane.xlu0 %86  ;;  %v180_v52 = vrot.slane %v99_v31, %v155_v46  ;;  %v425_v31 = vld [vmem:[%s1003_s5 + $0x8] sm:$0xff] }
  0x99   :  { %v156_v53 = vrot.slane %v87_v32, %v155_v46  ;;  %v687_v32 = vpack.c.bf16 %v425_v31, %v424_v30 }
  0x9a   :  { %v181_v2 = vsel %vm157_vm2, %v180_v52, %v176_v51 }
  0x9b   :  { %v102_v34 = vpop.xlane.xlu1 %101  ;;  %v158_v3 = vsel %vm157_vm2, %v156_v53, %v151_v58 }
  0x9c   :  { %v90_v35 = vpop.xlane.xlu0 %89  ;;  %v185_v54 = vrot.slane %v102_v34, %v162_v47 }
  0x9d   :  { %v163_v55 = vrot.slane %v90_v35, %v162_v47  ;;  %v428_v35 = vld [vmem:[%s1003_s5 + $0x20] sm:$0xff] }
  0x9e   :  { %v186_v6 = vsel %vm164_vm3, %v185_v54, %v181_v2 }
  0x9f   :  { %v111_v37 = vpop.xlane.xlu1 %110  ;;  %v165_v7 = vsel %vm164_vm3, %v163_v55, %v158_v3  ;;  %v438_v55 = vld [vmem:[%s1003_s5 + $0x70] sm:$0xff] }
  0xa0   :  { %v108_v38 = vpop.xlane.xlu0 %107  ;;  %v199_v56 = vrot.slane %v111_v37, %v155_v46  ;;  %v693_v37 = vpack.c.bf16 %v429_v36, %v428_v35 }
  0xa1   :  { %v195_v57 = vrot.slane %v108_v38, %v150_v45  ;;  %v430_v38 = vld [vmem:[%s1003_s5 + $0x30] sm:$0xff] }
  0xa2   :  { %v696_v40 = vpack.c.bf16 %v431_v39, %v430_v38 }
  0xa3   :  { %v105_v43 = vpop.xlane.xlu1 %104  ;;  %v200_v8 = vsel %vm157_vm2, %v199_v56, %v195_v57  ;;  %v439_v56 = vld [vmem:[%s1003_s5 + $0x78] sm:$0xff] }
  0xa4   :  { %v93_v44 = vpop.xlane.xlu0 %92  ;;  %v190_v59 = vrot.slane %v105_v43, %v169_v48  ;;  %v699_v43 = vpack.c.bf16 %v433_v42, %v432_v41  ;;  %v708_v57 = vpack.c.bf16 %v439_v56, %v438_v55 }
  0xa5   :  { %v170_v60 = vrot.slane %v93_v44, %v169_v48  ;;  %v434_v44 = vld [vmem:[%s1003_s5 + $0x50] sm:$0xff] }
  0xa6   :  { %v191_v9 = vsel %vm171_vm4, %v190_v59, %v186_v6 }
  0xa7   :  { %v120_v49 = vpop.xlane.xlu1 %119  ;;  %v172_v10 = vsel %vm171_vm4, %v170_v60, %v165_v7 }
  0xa8   :  { %v114_v50 = vpop.xlane.xlu0 %113  ;;  %v214_v11 = vrot.slane %v120_v49, %v150_v45  ;;  %v231_v19 = vsel %vm230_vm5, %v191_v9, %v172_v10  ;;  %v435_v45 = vld [vmem:[%s1003_s5 + $0x58] sm:$0xff] }
  0xa9   :  { %v204_v61 = vrot.slane %v114_v50, %v162_v47  ;;  %v532_v50 = vld [vmem:[%s1000_s2] ss:$0 sm:$0xff] }
  0xab   :  { %v117_v62 = vpop.xlane.xlu1 %116  ;;  %v205_v12 = vsel %vm164_vm3, %v204_v61, %v200_v8 }
  0xac   :  { %v123_v63 = vpop.xlane.xlu0 %122  ;;  %v209_v1 = vrot.slane %v117_v62, %v169_v48  ;;  %v535_v62 = vld [vmem:[%s1004_s6] ss:$0 sm:$0xff] }
  0xad   :  { %v218_v5 = vrot.slane %v123_v63, %v155_v46  ;;  %v702_v46 = vpack.c.bf16 %v435_v45, %v434_v44 }
  0xae   :  { %v210_v15 = vsel %vm171_vm4, %v209_v1, %v205_v12 }
  0xaf   :  { %v129_v14 = vpop.xlane.xlu1 %128  ;;  %v219_v18 = vsel %vm157_vm2, %v218_v5, %v214_v11  ;;  %v233_v22 = vsel %vm232_vm6, %v210_v15, %v231_v19 }
  0xb0   :  { %v126_v13 = vpop.xlane.xlu0 %125  ;;  %v228_v17 = vrot.slane %v129_v14, %v169_v48  ;;  %v437_v48 = vld [vmem:[%s1003_s5 + $0x68] sm:$0xff] }
  0xb1   :  { %v223_v16 = vrot.slane %v126_v13, %v162_v47  ;;  %v436_v47 = vld [vmem:[%s1003_s5 + $0x60] sm:$0xff] }
  0xb2   :  { %v705_v49 = vpack.c.bf16 %v437_v48, %v436_v47 }
  0xb3   :  { %v224_v20 = vsel %vm164_vm3, %v223_v16, %v219_v18 }
  0xb4   :  { %v229_v23 = vsel %vm171_vm4, %v228_v17, %v224_v20 }
  0xb5   :  { %v235_v24 = vsel %vm234_vm7, %v229_v23, %v233_v22 }
  0xb6   :  { %v237_v25 = vadd.f32 %v235_v24, %v81_v21 }
  0xb8   :  { %239 = vst.msk [vmem:[#allocation2] sm:$0xf] %vm31_vm0, %v237_v25 }
  0xbf   :  { %v243_v26 = vld [vmem:[#allocation2] sm:$0xf] }
  0xc0   :  { %584 = vmatmul.mubr.msk.f32.vlgmr.msra.gmra.mrb[0].mxu0 %vm255_vm8, %v243_v26 }
  0xc1   :  { %653 = vmatprep.mubr.msk.f32.mxu0 %vm740_vm1, %v738_v0  ;;  %v426_v0 = vld [vmem:[%s1003_s5 + $0x10] sm:$0xff]  ;;  %688 = vmatpush3.bf16.msra.mxu0 %v687_v32  ;;  %s714_s5 = scalar_lea.vmem %s525_s10, 64 }
  0xc2   :  { %v690_v34 = vpack.c.bf16 %v427_v33, %v426_v0  ;;  %689 = vmatprep.subr.bf16.mxu0 %v739_v4  ;;  %p715_p0 = scmp.ne.s32.totalorder %s525_s10, %s714_s5  ;;  %p720_p2 = scmp.lt.s32.totalorder %s714_s5, %s714_s5 }
  0xc4   :  { %p721_p3 = por %p720_p2, %p719_p1 }
  0xc5   :  { %691 = vmatpush3.bf16.msra.mxu0 %v690_v34 }
  0xc6   :  { %692 = vmatprep.subr.bf16.mxu0 %v739_v4  ;;  %p722_p4 = pnand %p721_p3, %p715_p0 }
  0xc9   :  { %694 = vmatpush3.bf16.msra.mxu0 %v693_v37 }
  0xca   :  { %695 = vmatprep.subr.bf16.mxu0 %v739_v4 }
  0xcd   :  { %697 = vmatpush3.bf16.msra.mxu0 %v696_v40 }
  0xce   :  { %698 = vmatprep.subr.bf16.mxu0 %v739_v4 }
  0xd1   :  { %700 = vmatpush3.bf16.msra.mxu0 %v699_v43 }
  0xd2   :  { %701 = vmatprep.subr.bf16.mxu0 %v739_v4 }
  0xd5   :  { %703 = vmatpush3.bf16.msra.mxu0 %v702_v46 }
  0xd6   :  { %704 = vmatprep.subr.bf16.mxu0 %v739_v4 }
  0xd9   :  { %706 = vmatpush3.bf16.msra.mxu0 %v705_v49 }
  0xda   :  { %707 = vmatprep.subr.bf16.mxu0 %v739_v4  ;;  %v534_v4 = vld [vmem:[%s1002_s4] ss:$0 sm:$0xff] }
  0xdd   :  { %709 = vmatpush3.bf16.msra.mxu0 %v708_v57 }
 0x193   :  { %v325_v51 = vpop.f32.mrb[0].mxu0 }
 0x194   :  { %v326_v52 = vadd.f32 %v532_v50, %v325_v51  ;;  %v585_v53 = vpop.f32.mrb[1].mxu0 }
 0x196   :  { %v329_v54 = vmax.f32 %v326_v52, 0.0 }
 0x198   :  { %619 = vmatmul.mubr.f32.vlgmr.msra.gmra.mrb[0].mxu1 %v329_v54 }
 0x26b   :  { %v419_v58 = vpop.f32.mrb[0].mxu1 }
 0x26c   :  { %v420_v59 = vadd.f32 %v534_v4, %v419_v58  ;;  %v620_v60 = vpop.f32.mrb[1].mxu1 }
 0x26e   :  { %v423_v61 = vmax.f32 %v420_v59, 0.0 }
 0x270   :  { %654 = vmatmul.mubr.f32.vlgmr.msra.gmra.mrb[2].mxu0 %v423_v61 }
 0x343   :  { %v513_v63 = vpop.f32.mrb[2].mxu0 }
 0x344   :  { %v514_v1 = vadd.f32 %v535_v62, %v513_v63  ;;  %v655_v2 = vpop.f32.mrb[3].mxu0 }
 0x346   :  { %517 = vst [vmem:[#allocation3] sm:$0xf] %v514_v1 }
 0x347   :  { %725 = shalt.err (!%p722_p4)
}
 0x348   :  { %s726_s12 = scalar_lea.hbm %s1005_s7, 64 }
 0x349   :  { %p727_p5 = scmp.ne.s32.totalorder %s1005_s7, %s726_s12  ;;  %p730_p6 = scmp.lt.u32.totalorder %s726_s12, %s1005_s7 }
 0x34b   :  { %p732_p7 = pnand %p730_p6, %p727_p5 }
 0x34d   :  { %735 = shalt.err (!%p732_p7)
}
 0x34e   :  { %527 = dma.vmem_to_hbm [thread:$0]  %s525_s10, 64, %s1005_s7, [#allocation4]  }
 0x34f   :  { %736 = dma.done.wait [#allocation4], 64  }
 0x350   :  { %737 = vsyncadd [#allocation4], 4294967232 }
 0x351   :  { %531 = vsyncpa [#allocation4], 1 }

</bundles_post_ra>
